<compile_context>
chip_gen: v7x
topology: tpu7x:2x2x1
jax: 0.10.0
libtpu: 0.0.40
codegen_flags: <defaults>
</compile_context>

<pallas_src>
import math

import jax
import jax.numpy as jnp
from jax.experimental import pallas as pl
from jax.experimental.pallas import tpu as pltpu


def _round_up(x, m):
    return (x + m - 1) // m * m


def fm_kernel(x_ref, vv_ref, o_ref, acc_sq_ref):
    """Grid = (batch tiles, K tiles); K (reduction, input_dim) axis is last.

    x_ref     : (tm, tk)        input tile (f32 or bf16)
    vv_ref    : (rows, 2*Lp)    [v | v^2]; either the k-th (tk, 2*Lp) block
                                or the whole (Dp, 2*Lp) array resident in VMEM
    o_ref     : (tm, Lp)        f32 output block; doubles as the x@v accumulator
    acc_sq_ref: (tm, Lp)        f32 accumulator for (x^2)@(v^2)
    """
    k = pl.program_id(1)

    @pl.when(k == 0)
    def _():
        o_ref[...] = jnp.zeros_like(o_ref)
        acc_sq_ref[...] = jnp.zeros_like(acc_sq_ref)

    tm, tk = x_ref.shape
    rows, two_lp = vv_ref.shape
    lp = two_lp // 2

    x = x_ref[...]
    x2 = x * x                       # elementwise square in the operand dtype

    if rows == tk:
        # vv block is already the k-th reduction slice (or the single full-D step).
        v = vv_ref[:, :lp]
        v2 = vv_ref[:, lp:]
    else:
        # vv is fully resident across the whole reduction: slice the k-th window.
        off = pl.multiple_of(k * tk, tk)
        v = vv_ref[pl.ds(off, tk), :lp]
        v2 = vv_ref[pl.ds(off, tk), lp:]

    o_ref[...] += jnp.dot(x, v, preferred_element_type=jnp.float32)
    acc_sq_ref[...] += jnp.dot(x2, v2, preferred_element_type=jnp.float32)

    @pl.when(k == pl.num_programs(1) - 1)
    def _():
        s = o_ref[...]               # square only AFTER the full-K sum
        o_ref[...] = 0.5 * (s * s - acc_sq_ref[...])


def fm_forward(x, v, *, tm=1024, tk=2048, matmul_dtype=jnp.float32,
               v_resident=None):
    """Factorization Machine pairwise interactions via Pallas.

    Args:
      x: [B, D] input features.
      v: [D, L] latent factor matrix.
      tm: target batch tile (multiple of 8, or 16 for bf16). Sweep on real shapes.
      tk: reduction (input_dim) tile (multiple of 128) used when D > tk.
      matmul_dtype: MXU operand dtype. f32 (default) matches the PyTorch module;
        bf16 halves x/v HBM+VMEM traffic (accumulation stays f32) but rounds the
        nearly-cancelling FM terms.
      v_resident: force/forbid keeping [v | v^2] fully resident in VMEM
        (None = auto based on size).
    Returns:
      [B, L] float32 interaction tensor.
    """
    B, D = x.shape
    Dv, L = v.shape
    assert D == Dv
    matmul_dtype = jnp.dtype(matmul_dtype)
    assert matmul_dtype in (jnp.dtype(jnp.float32), jnp.dtype(jnp.bfloat16))

    x_dtype = matmul_dtype                 # ship x in the MXU operand dtype
    x_bytes = x_dtype.itemsize
    v_bytes = matmul_dtype.itemsize

    # Lane-dense output: pad latent dim to a multiple of 128. Padded columns of
    # v are zero -> padded output columns are exactly zero, sliced off below.
    Lp = _round_up(L, 128)

    # --- Batch tiling: balanced tiles, sublane-aligned; at least 2 tiles when
    # B allows so the "parallel" axis can shard across both v7x TensorCores. ---
    align = 16 if x_dtype == jnp.dtype(jnp.bfloat16) else 8
    assert tm % align == 0 and tk % 128 == 0
    n_bt = max(1, math.ceil(B / tm))
    if n_bt == 1 and B >= 2 * align:
        n_bt = 2
    tm_eff = _round_up(math.ceil(B / n_bt), align)
    Bp = n_bt * tm_eff

    # --- Reduction tiling: single full-D step when it fits (no D padding at
    # all), otherwise balanced 128-aligned K tiles accumulated in VMEM. ---
    if D <= tk:
        n_k, tk_eff, Dp = 1, D, D
    else:
        n_k = math.ceil(D / tk)
        tk_eff = _round_up(math.ceil(D / n_k), 128)
        Dp = n_k * tk_eff

    # --- [v | v^2]: computed once (hoisted), one operand -> one DMA per block.
    vf = v.astype(jnp.float32)
    v2f = vf * vf
    vv = jnp.concatenate(
        [jnp.pad(vf, ((0, Dp - D), (0, Lp - L))),
         jnp.pad(v2f, ((0, Dp - D), (0, Lp - L)))], axis=1).astype(matmul_dtype)

    vv_resident_bytes = 2 * Dp * (2 * Lp) * v_bytes   # double-buffered cost
    if v_resident is None:
        v_resident = vv_resident_bytes <= (16 << 20)
    if n_k == 1:
        v_resident = True     # single K step: the block IS the whole array

    # --- x: avoid any extra pad/cast HBM pass when shapes/dtype already fit.
    x_in = x if x.dtype == x_dtype else x.astype(x_dtype)
    if Bp != B or Dp != D:
        # Reduction-dim padding MUST be zeros (it feeds valid output rows);
        # batch-dim pad rows produce zeros that are sliced off below.
        x_in = jnp.pad(x_in, ((0, Bp - B), (0, Dp - D)))

    if v_resident:
        vv_spec = pl.BlockSpec((Dp, 2 * Lp), lambda i, k: (0, 0))
        v_rows = Dp
    else:
        vv_spec = pl.BlockSpec((tk_eff, 2 * Lp), lambda i, k: (k, 0))
        v_rows = tk_eff

    # VMEM budget from actual dtypes; cap below v7x's 64 MiB physical VMEM.
    est = (2 * tm_eff * tk_eff * x_bytes         # double-buffered x blocks
           + 2 * v_rows * 2 * Lp * v_bytes       # [v | v^2] blocks
           + 2 * tm_eff * Lp * 4                 # output blocks
           + tm_eff * Lp * 4)                    # acc_sq scratch
    vmem_limit = int(min(max(est + est // 2 + (4 << 20), 32 << 20), 48 << 20))

    out = pl.pallas_call(
        fm_kernel,
        out_shape=jax.ShapeDtypeStruct((Bp, Lp), jnp.float32),
        grid_spec=pltpu.PrefetchScalarGridSpec(
            num_scalar_prefetch=0,
            grid=(n_bt, n_k),
            in_specs=[
                # x tiled over (batch, reduction).
                pl.BlockSpec((tm_eff, tk_eff), lambda i, k: (i, k)),
                # [v | v^2]: resident (constant block) or K-tiled.
                vv_spec,
            ],
            # Output block fixed across k (accumulator); lane-dense (Lp >= 128).
            out_specs=pl.BlockSpec((tm_eff, Lp), lambda i, k: (i, 0)),
            scratch_shapes=[pltpu.VMEM((tm_eff, Lp), jnp.float32)],
        ),
        compiler_params=pltpu.CompilerParams(
            dimension_semantics=("parallel", "arbitrary"),
            vmem_limit_bytes=vmem_limit,
        ),
    )(x_in, vv)

    if Bp != B or Lp != L:
        out = out[:B, :L]
    return out


def fm_reference(x, v):
    # Pure-JAX reference mirroring the PyTorch forward exactly (f32).
    squared_sum = jnp.power(jnp.matmul(x, v), 2)
    sum_of_squares = jnp.matmul(jnp.power(x, 2), jnp.power(v, 2))
    return 0.5 * (squared_sum - sum_of_squares)


if __name__ == "__main__":
    key = jax.random.PRNGKey(0)
    k_x, k_v = jax.random.split(key)

    batch, input_dim, latent_dim = 8, 32, 16
    x = jax.random.normal(k_x, (batch, input_dim), dtype=jnp.float32)
    v = jax.random.normal(k_v, (input_dim, latent_dim), dtype=jnp.float32)

    ref = fm_reference(x, v)

    # Default exact path (f32 operands, matches the PyTorch module).
    out = jax.block_until_ready(fm_forward(x, v))
    assert out.shape == (batch, latent_dim)
    assert jnp.allclose(out, ref, atol=1e-4, rtol=1e-4), "f32 mismatch vs reference"

    # Optional fast path (bf16 MXU operands + bf16 x stream, f32 accumulation).
    out_fast = jax.block_until_ready(fm_forward(x, v, matmul_dtype=jnp.bfloat16))
    assert out_fast.shape == (batch, latent_dim)
    assert jnp.allclose(out_fast, ref, atol=1.0, rtol=5e-2), "bf16 mismatch vs reference"

    # Ragged batch + tiled reduction axis + resident [v|v^2] with dynamic K slice.
    k_x2, k_v2 = jax.random.split(jax.random.PRNGKey(1))
    B2, D2, L2 = 20, 384, 10
    x2 = jax.random.normal(k_x2, (B2, D2), dtype=jnp.float32)
    v2 = jax.random.normal(k_v2, (D2, L2), dtype=jnp.float32)
    ref2 = fm_reference(x2, v2)
    out2 = jax.block_until_ready(fm_forward(x2, v2, tk=128))
    assert out2.shape == (B2, L2)
    assert jnp.allclose(out2, ref2, atol=5e-2, rtol=1e-3), "tiled-K mismatch vs reference"

    # Same shapes but forcing the K-tiled (non-resident) [v|v^2] path.
    out3 = jax.block_until_ready(fm_forward(x2, v2, tk=128, v_resident=False))
    assert jnp.allclose(out3, ref2, atol=5e-2, rtol=1e-3), \
        "non-resident-v mismatch vs reference"

    print("KERNEL_OK")
</pallas_src>

<mosaic_0001>
module attributes {stable_mosaic.version = 11 : i64} {
  func.func @fm_kernel(%arg0: i32, %arg1: i32, %arg2: memref<8x32xf32, #tpu.memory_space<vmem>>, %arg3: memref<32x256xf32, #tpu.memory_space<vmem>>, %arg4: memref<8x128xf32, #tpu.memory_space<vmem>>, %arg5: memref<8x128xf32, #tpu.memory_space<vmem>>) attributes {dimension_semantics = [#tpu.dimension_semantics<parallel>, #tpu.dimension_semantics<arbitrary>], iteration_bounds = array<i64: 1, 1>, scalar_prefetch = 0 : i64, scratch_operands = 1 : i64, tpu.core_type = #tpu.core_type<tc>, window_params = [{transform_indices = @transform_0, window_bounds = array<i64: 8, 32>}, {pipeline_mode = #tpu.pipeline_mode<synchronous>, transform_indices = @transform_1, window_bounds = array<i64: 32, 256>}, {transform_indices = @transform_2, window_bounds = array<i64: 8, 128>}]} {
    %c0_i32 = arith.constant 0 : i32
    %0 = arith.cmpi eq, %arg1, %c0_i32 : i32
    %1 = arith.extui %0 : i1 to i32
    %c0_i32_0 = arith.constant 0 : i32
    %2 = arith.cmpi ne, %1, %c0_i32_0 : i32
    scf.if %2 {
      %cst_16 = arith.constant 0.000000e+00 : f32
      %18 = vector.broadcast %cst_16 : f32 to vector<8x128xf32>
      %c0_17 = arith.constant 0 : index
      %c0_18 = arith.constant 0 : index
      %19 = vector.load %arg4[%c0_17, %c0_18] : memref<8x128xf32, #tpu.memory_space<vmem>>, vector<8x128xf32>
      tpu.vector_store %arg4[%c0_17, %c0_18], %18 {strides = array<i32>} : memref<8x128xf32, #tpu.memory_space<vmem>>, vector<8x128xf32>,
      %cst_19 = arith.constant 0.000000e+00 : f32
      %20 = vector.broadcast %cst_19 : f32 to vector<8x128xf32>
      %c0_20 = arith.constant 0 : index
      %c0_21 = arith.constant 0 : index
      %21 = vector.load %arg5[%c0_20, %c0_21] : memref<8x128xf32, #tpu.memory_space<vmem>>, vector<8x128xf32>
      tpu.vector_store %arg5[%c0_20, %c0_21], %20 {strides = array<i32>} : memref<8x128xf32, #tpu.memory_space<vmem>>, vector<8x128xf32>,
    } else {
    }
    %c0 = arith.constant 0 : index
    %c0_1 = arith.constant 0 : index
    %3 = vector.load %arg2[%c0, %c0_1] : memref<8x32xf32, #tpu.memory_space<vmem>>, vector<8x32xf32>
    %4 = arith.mulf %3, %3 : vector<8x32xf32>
    %c0_2 = arith.constant 0 : index
    %c0_3 = arith.constant 0 : index
    %5 = vector.load %arg3[%c0_2, %c0_3] : memref<32x256xf32, #tpu.memory_space<vmem>>, vector<32x128xf32>
    %c0_4 = arith.constant 0 : index
    %c128 = arith.constant 128 : index
    %6 = vector.load %arg3[%c0_4, %c128] : memref<32x256xf32, #tpu.memory_space<vmem>>, vector<32x128xf32>
    %c0_5 = arith.constant 0 : index
    %c0_6 = arith.constant 0 : index
    %7 = vector.load %arg4[%c0_5, %c0_6] : memref<8x128xf32, #tpu.memory_space<vmem>>, vector<8x128xf32>
    %cst = arith.constant dense<0.000000e+00> : vector<8x128xf32>
    %8 = tpu.matmul %3, %5, %cst {dimension_numbers = #tpu.dot_dimension_numbers<[1], [0], [0], [1], [0, 0, 1, 1], [], []>} : vector<8x32xf32>, vector<32x128xf32>, vector<8x128xf32> -> vector<8x128xf32>
    %9 = arith.addf %7, %8 : vector<8x128xf32>
    %c0_7 = arith.constant 0 : index
    %c0_8 = arith.constant 0 : index
    %10 = vector.load %arg4[%c0_7, %c0_8] : memref<8x128xf32, #tpu.memory_space<vmem>>, vector<8x128xf32>
    tpu.vector_store %arg4[%c0_7, %c0_8], %9 {strides = array<i32>} : memref<8x128xf32, #tpu.memory_space<vmem>>, vector<8x128xf32>,
    %c0_9 = arith.constant 0 : index
    %c0_10 = arith.constant 0 : index
    %11 = vector.load %arg5[%c0_9, %c0_10] : memref<8x128xf32, #tpu.memory_space<vmem>>, vector<8x128xf32>
    %cst_11 = arith.constant dense<0.000000e+00> : vector<8x128xf32>
    %12 = tpu.matmul %4, %6, %cst_11 {dimension_numbers = #tpu.dot_dimension_numbers<[1], [0], [0], [1], [0, 0, 1, 1], [], []>} : vector<8x32xf32>, vector<32x128xf32>, vector<8x128xf32> -> vector<8x128xf32>
    %13 = arith.addf %11, %12 : vector<8x128xf32>
    %c0_12 = arith.constant 0 : index
    %c0_13 = arith.constant 0 : index
    %14 = vector.load %arg5[%c0_12, %c0_13] : memref<8x128xf32, #tpu.memory_space<vmem>>, vector<8x128xf32>
    tpu.vector_store %arg5[%c0_12, %c0_13], %13 {strides = array<i32>} : memref<8x128xf32, #tpu.memory_space<vmem>>, vector<8x128xf32>,
    %c0_i32_14 = arith.constant 0 : i32
    %15 = arith.cmpi eq, %arg1, %c0_i32_14 : i32
    %16 = arith.extui %15 : i1 to i32
    %c0_i32_15 = arith.constant 0 : i32
    %17 = arith.cmpi ne, %16, %c0_i32_15 : i32
    scf.if %17 {
      %c0_16 = arith.constant 0 : index
      %c0_17 = arith.constant 0 : index
      %18 = vector.load %arg4[%c0_16, %c0_17] : memref<8x128xf32, #tpu.memory_space<vmem>>, vector<8x128xf32>
      %19 = arith.mulf %18, %18 : vector<8x128xf32>
      %c0_18 = arith.constant 0 : index
      %c0_19 = arith.constant 0 : index
      %20 = vector.load %arg5[%c0_18, %c0_19] : memref<8x128xf32, #tpu.memory_space<vmem>>, vector<8x128xf32>
      %21 = arith.subf %19, %20 : vector<8x128xf32>
      %cst_20 = arith.constant 5.000000e-01 : f32
      %22 = vector.broadcast %cst_20 : f32 to vector<8x128xf32>
      %23 = arith.mulf %22, %21 : vector<8x128xf32>
      %c0_21 = arith.constant 0 : index
      %c0_22 = arith.constant 0 : index
      %24 = vector.load %arg4[%c0_21, %c0_22] : memref<8x128xf32, #tpu.memory_space<vmem>>, vector<8x128xf32>
      tpu.vector_store %arg4[%c0_21, %c0_22], %23 {strides = array<i32>} : memref<8x128xf32, #tpu.memory_space<vmem>>, vector<8x128xf32>,
    } else {
    }
    return
  }
  func.func @transform_0(%arg0: i32, %arg1: i32) -> (i32, i32) {
    %c0_i32 = arith.constant 0 : i32
    return %arg0, %arg1 : i32, i32
  }
  func.func @transform_1(%arg0: i32, %arg1: i32) -> (i32, i32) {
    %c0_i32 = arith.constant 0 : i32
    %c0_i32_0 = arith.constant 0 : i32
    %c0_i32_1 = arith.constant 0 : i32
    return %c0_i32, %c0_i32_0 : i32, i32
  }
  func.func @transform_2(%arg0: i32, %arg1: i32) -> (i32, i32) {
    %c0_i32 = arith.constant 0 : i32
    %c0_i32_0 = arith.constant 0 : i32
    return %arg0, %c0_i32 : i32, i32
  }
}

</mosaic_0001>

<bundles_post_ra>
// kernel: tpu_custom_call.1
= control target key start
LH: loop header
LB: loop body
LE: loop exit
PB: predicated region body
PF: predicated region fallthrough
CT: control target
= control target key end

     0   :  { %7 = vsyncpa [#allocation4], 0  ;;  %s424_s0 = inlined_call_operand.hbm [shape: f32[8,32], index: 0, kind: input, shape index: {}]   ;;  %s425_s1 = inlined_call_operand.hbm [shape: f32[32,256], index: 1, kind: input, shape index: {}]   ;;  %s426_s2 = inlined_call_operand.hbm [shape: f32[8,128], index: 2, kind: output, shape index: {}]  }
   0x1   :  { %8 = vsyncpa [#allocation7], 0 }
   0x2   :  { %9 = vsyncpa [#allocation5], 0  ;;  %s358_s9 = smov [#allocation3]   ;;  %s359_s11 = smov [#allocation6]  }
   0x3   :  { %s16_s10 = sshll.u32 %s358_s9, 4  ;;  %s25_s12 = sshll.u32 %s359_s11, 4  ;;  %s17_s10 = int_to_ptr.vmem [resolvable:$true] %s16_s10  ;;  %s381_s12 = int_to_ptr.vmem [resolvable:$true] %s25_s12 }
   0x4   :  { %s286_s15 = scalar_lea.hbm %s424_s0, 128 }
   0x5   :  { %p287_p0 = scmp.ne.s32.totalorder %s424_s0, %s286_s15  ;;  %p290_p1 = scmp.lt.u32.totalorder %s286_s15, %s424_s0 }
   0x7   :  { %p292_p2 = pnand %p290_p1, %p287_p0 }
   0x9   :  { %295 = shalt.err (!%p292_p2)
}
   0xa   :  { %s296_s20 = scalar_lea.vmem %s17_s10, 128  ;;  %p301_p4 = scmp.lt.s32.totalorder %s17_s10, %s17_s10 }
   0xb   :  { %p297_p3 = scmp.ne.s32.totalorder %s17_s10, %s296_s20  ;;  %p302_p5 = scmp.lt.s32.totalorder %s296_s20, %s296_s20 }
   0xd   :  { %p303_p6 = por %p302_p5, %p301_p4 }
   0xf   :  { %p304_p7 = pnand %p303_p6, %p297_p3 }
  0x11   :  { %307 = shalt.err (!%p304_p7)
}
  0x12   :  { %19 = dma.hbm_to_vmem [thread:$0]  %s424_s0, 128, %s17_s10, [#allocation4]  }
  0x13   :  { %s308_s25 = scalar_lea.hbm %s425_s1, 1024 }
  0x14   :  { %p309_p8 = scmp.ne.s32.totalorder %s425_s1, %s308_s25  ;;  %p312_p9 = scmp.lt.u32.totalorder %s308_s25, %s425_s1 }
  0x16   :  { %p314_p10 = pnand %p312_p9, %p309_p8 }
  0x18   :  { %317 = shalt.err (!%p314_p10)
}
  0x19   :  { %s318_s30 = scalar_lea.vmem %s381_s12, 1024  ;;  %p323_p12 = scmp.lt.s32.totalorder %s381_s12, %s381_s12 }
  0x1a   :  { %p319_p11 = scmp.ne.s32.totalorder %s381_s12, %s318_s30  ;;  %p324_p13 = scmp.lt.s32.totalorder %s318_s30, %s318_s30 }
  0x1c   :  { %p325_p0 = por %p324_p13, %p323_p12 }
  0x1e   :  { %p326_p1 = pnand %p325_p0, %p319_p11 }
  0x20   :  { %329 = shalt.err (!%p326_p1)
}
  0x21   :  { %s360_s0 = smov 256   ;;  %s361_s3 = smov 16  }
  0x22   :  { %31 = dma.hbm_to_vmem [thread:$0]  %s425_s1, 1024, %s381_s12, [#allocation7], %s360_s0, %s360_s0, %s361_s3  }
  0x23   :  { %352 = dma.done.wait [#allocation4], 128  }
  0x24   :  { %353 = vsyncadd [#allocation4], 4294967168 }
  0x25   :  { %354 = dma.done.wait [#allocation7], 1024  }
  0x26   :  { %355 = vsyncadd [#allocation7], 4294966272  ;;  %v362_v0 = vmov 0.0|0.0   ;;  %vm363_vm0 = vmmov 0   ;;  %v364_v1 = vmov 0.0   ;;  %v46_v2 = vld [vmem:[#allocation6] sm:$0xff] }
  0x27   :  { %266 = vmatprep.subr.bf16.mxu0 %v362_v0  ;;  %252 = vmatprep.mubr.msk.f32.mxu0 %vm363_vm0, %v364_v1  ;;  %v47_v3 = vld [vmem:[#allocation6 + $0x10] sm:$0xff]  ;;  %v48_v4 = vld [vmem:[#allocation6 + $0x20] sm:$0xff]  ;;  %v50_v7 = vld [vmem:[#allocation6 + $0x8] sm:$0xff]  ;;  %vm55_vm1 = vcmask 261120   ;;  %s365_s1 = smov [#allocation8]  }
  0x28   :  { %272 = vmatprep.subr.bf16.mxu1 %v362_v0  ;;  %263 = vmatprep.mubr.msk.f32.mxu1 %vm363_vm0, %v364_v1  ;;  %v267_v5 = vpack.c.bf16 %v47_v3, %v46_v2  ;;  %v49_v6 = vld [vmem:[#allocation6 + $0x30] sm:$0xff]  ;;  %v51_v8 = vld [vmem:[#allocation6 + $0x18] sm:$0xff]  ;;  %v52_v9 = vld [vmem:[#allocation6 + $0x28] sm:$0xff]  ;;  %s222_s6 = sshll.u32 %s365_s1, 4  ;;  %s223_s6 = int_to_ptr.vmem [resolvable:$true] %s222_s6 }
  0x29   :  { %v53_v10 = vld [vmem:[#allocation6 + $0x38] sm:$0xff]  ;;  %v270_v11 = vpack.c.bf16 %v49_v6, %v48_v4  ;;  %v273_v12 = vpack.c.bf16 %v51_v8, %v50_v7  ;;  %s330_s7 = scalar_lea.vmem %s223_s6, 128  ;;  %p335_p3 = scmp.lt.s32.totalorder %s223_s6, %s223_s6 }
  0x2a   :  { %268 = vmatpush3.bf16.msra.mxu0 %v267_v5  ;;  %v44_v13 = vld [vmem:[#allocation3] sm:$0xff]  ;;  %v276_v14 = vpack.c.bf16 %v53_v10, %v52_v9  ;;  %p331_p2 = scmp.ne.s32.totalorder %s223_s6, %s330_s7  ;;  %p336_p4 = scmp.lt.s32.totalorder %s330_s7, %s330_s7 }
  0x2b   :  { %269 = vmatprep.subr.bf16.mxu0 %v362_v0  ;;  %274 = vmatpush3.bf16.msra.mxu1 %v273_v12  ;;  %v45_v15 = vmul.f32 %v44_v13, %v44_v13 }
  0x2c   :  { %275 = vmatprep.subr.bf16.mxu1 %v362_v0  ;;  %p337_p5 = por %p336_p4, %p335_p3 }
  0x2e   :  { %271 = vmatpush3.bf16.msra.mxu0 %v270_v11  ;;  %p338_p6 = pnand %p337_p5, %p331_p2 }
  0x2f   :  { %277 = vmatpush3.bf16.msra.mxu1 %v276_v14 }
  0x31   :  { %253 = vmatmul.mubr.msk.f32.vlgmr.msra.gmra.mrb[0].mxu0 %vm55_vm1, %v44_v13 }
  0x32   :  { %264 = vmatmul.mubr.msk.f32.vlgmr.msra.gmra.mrb[0].mxu1 %vm55_vm1, %v45_v15 }
 0x104   :  { %v125_v16 = vpop.f32.mrb[0].mxu0 }
 0x105   :  { %v254_v17 = vpop.f32.mrb[1].mxu0  ;;  %v201_v18 = vpop.f32.mrb[0].mxu1  ;;  %v211_v19 = vmul.f32 %v125_v16, %v125_v16 }
 0x106   :  { %v265_v20 = vpop.f32.mrb[1].mxu1 }
 0x107   :  { %v213_v21 = vsub.f32 %v211_v19, %v201_v18 }
 0x109   :  { %v214_v22 = vmul.f32 0.5, %v213_v21 }
 0x10b   :  { %215 = vst [vmem:[#allocation8] sm:$0xff] %v214_v22 }
 0x10c   :  { %341 = shalt.err (!%p338_p6)
}
 0x10d   :  { %s342_s10 = scalar_lea.hbm %s426_s2, 128 }
 0x10e   :  { %p343_p7 = scmp.ne.s32.totalorder %s426_s2, %s342_s10  ;;  %p346_p8 = scmp.lt.u32.totalorder %s342_s10, %s426_s2 }
 0x110   :  { %p348_p9 = pnand %p346_p8, %p343_p7 }
 0x112   :  { %351 = shalt.err (!%p348_p9)
}
 0x113   :  { %225 = dma.vmem_to_hbm [thread:$0]  %s223_s6, 128, %s426_s2, [#allocation5]  }
 0x114   :  { %356 = dma.done.wait [#allocation5], 128  }
 0x115   :  { %357 = vsyncadd [#allocation5], 4294967168 }
 0x116   :  { %229 = vsyncpa [#allocation4], 1 }
 0x117   :  { %230 = vsyncpa [#allocation7], 1 }
 0x118   :  { %231 = vsyncpa [#allocation5], 1 }

</bundles_post_ra>
